<compile_context>
chip_gen: v5e
topology: v5e:2x2
jax: 0.10.0
libtpu: 0.0.40
codegen_flags: <defaults>
</compile_context>

<pallas_src>
import jax
import jax.numpy as jnp
from jax.experimental import pallas as pl
from jax.experimental.pallas import tpu as pltpu


_LANE = 128
_MIN_PIPELINE_BYTES = 1 << 20       # below this, a single block is fine
_MIN_GRID_STEPS = 8                 # enough steps to overlap read/write DMA
_DEFAULT_BLOCK_BYTES = 8 << 20      # ~8 MiB per buffer


def _exp_kernel(x_ref, o_ref):
    # Whole-tile elementwise exp (EUP transcendental; kernel is HBM-bound).
    o_ref[...] = jnp.exp(x_ref[...])


def _tpu_vmem_capacity_bytes():
    """Best-effort per-core VMEM capacity; conservative fallback if unknown."""
    try:
        info = pltpu.get_tpu_info()
        cap = getattr(info, "vmem_capacity_bytes", None)
        if cap:
            return int(cap)
    except Exception:
        pass
    return 64 << 20  # v7x per-TC VMEM (the smallest current generation)


def _choose_layout(n, itemsize, target_block_bytes):
    """Pick (lane, rows, block_rows) for a lane-dense 2D slab of n elements.

    Caller guarantees n % 128 == 0 (ragged tails are handled outside the
    kernel), so no padding or copy is ever needed here.
    """
    sublane = {4: 8, 2: 16, 1: 32}.get(itemsize, 8)

    # Widest lane dim (multiple of 128) that divides n exactly.
    lane = _LANE
    for cand in (4096, 2048, 1024, 512, 256):
        if n % cand == 0:
            lane = cand
            break
    rows = n // lane
    slab_bytes = n * itemsize

    # Tiny slab: one block covering everything (full-extent rows is legal even
    # when not a sublane multiple); pipelining overhead isn't worth it.
    if slab_bytes <= _MIN_PIPELINE_BYTES:
        return lane, rows, rows

    # Large slab: keep at least _MIN_GRID_STEPS grid steps so the input-read
    # and output-write DMA streams overlap (and a 2-TC chip has enough steps
    # to shard), while never exceeding the per-buffer VMEM target.
    target_rows = max(sublane, target_block_bytes // (lane * itemsize))
    steps_cap_rows = -(-rows // _MIN_GRID_STEPS)        # ceil(rows / MIN_STEPS)
    block_rows = min(target_rows, steps_cap_rows)
    # Round down to a sublane multiple for unmasked, full-tile vld/vst.
    block_rows = max(sublane, (block_rows // sublane) * sublane)
    block_rows = min(block_rows, rows)
    if block_rows != rows and block_rows % sublane:
        block_rows = rows  # safety net: a full-extent block is always legal
    return lane, rows, block_rows


def _exp_slab(x2d, block_rows, vmem_limit_bytes):
    rows, lane = x2d.shape
    itemsize = jnp.dtype(x2d.dtype).itemsize
    n = rows * lane
    grid = (pl.cdiv(rows, block_rows),)
    # TODO(synk): on v7x, verify both TensorCores issue DMAs with plain
    # "parallel" semantics; if not, switch this axis to pltpu.CORE_PARALLEL.
    return pl.pallas_call(
        _exp_kernel,
        out_shape=jax.ShapeDtypeStruct((rows, lane), x2d.dtype),
        grid=grid,
        in_specs=[pl.BlockSpec((block_rows, lane), lambda i: (i, 0))],
        out_specs=pl.BlockSpec((block_rows, lane), lambda i: (i, 0)),
        compiler_params=pltpu.CompilerParams(
            dimension_semantics=("parallel",),
            vmem_limit_bytes=vmem_limit_bytes,
        ),
        cost_estimate=pl.CostEstimate(
            flops=0,
            transcendentals=n,
            bytes_accessed=2 * n * itemsize,
        ),
    )(x2d)


def post_act_exp(x):
    """PostAct(act='exp') forward: elementwise exp, same shape/dtype as x."""
    orig_shape = x.shape
    dtype = x.dtype
    assert jnp.issubdtype(dtype, jnp.floating), "PostAct exp expects a float dtype"

    n = x.size
    itemsize = jnp.dtype(dtype).itemsize
    x_flat = jnp.reshape(x, (-1,))

    bulk = (n // _LANE) * _LANE
    if bulk == 0:
        # Tiny tensor (< 128 elements): not worth a kernel launch.
        return jnp.exp(x)

    vmem_cap = _tpu_vmem_capacity_bytes()
    target_block_bytes = min(_DEFAULT_BLOCK_BYTES, max(vmem_cap // 8, 1 << 20))
    lane, rows, block_rows = _choose_layout(bulk, itemsize, target_block_bytes)

    # in + out, double-buffered, plus headroom.  Always set explicitly so the
    # tile size behaves the same across the 16/32/32 MiB generation defaults.
    block_bytes = block_rows * lane * itemsize
    vmem_limit = int(min(max(4 * block_bytes + (8 << 20), 32 << 20),
                         vmem_cap * 3 // 4))

    bulk_in = x_flat if bulk == n else x_flat[:bulk]
    out2d = _exp_slab(bulk_in.reshape(rows, lane), block_rows, vmem_limit)

    if bulk == n:
        return out2d.reshape(orig_shape)

    # Ragged tail (< 128 elements): plain JAX, stitched back on.
    # TODO(synk): a masked in-kernel tail store would avoid this small
    # concatenate pass over the output.
    tail = jnp.exp(x_flat[bulk:])
    return jnp.concatenate([out2d.reshape(-1), tail]).reshape(orig_shape)


if __name__ == "__main__":
    key = jax.random.PRNGKey(0)
    # Small NCHW input consistent with the module: (N=2, C=4, H=16, W=16)
    x = jax.random.normal(key, (2, 4, 16, 16), dtype=jnp.float32)

    y = post_act_exp(x)
    y = jax.block_until_ready(y)

    # Correctness check against plain JAX reference.
    y_ref = jnp.exp(x)
    assert y.shape == x.shape and y.dtype == x.dtype
    assert jnp.allclose(y, y_ref, rtol=1e-6, atol=1e-6)

    print("KERNEL_OK")
</pallas_src>

<mosaic_0001>
module attributes {stable_mosaic.version = 11 : i64} {
  func.func @_exp_kernel(%arg0: i32, %arg1: memref<1x2048xf32, #tpu.memory_space<vmem>>, %arg2: memref<1x2048xf32, #tpu.memory_space<vmem>>) attributes {dimension_semantics = [#tpu.dimension_semantics<parallel>], iteration_bounds = array<i64: 1>, scalar_prefetch = 0 : i64, scratch_operands = 0 : i64, tpu.core_type = #tpu.core_type<tc>, window_params = [{transform_indices = @transform_0, window_bounds = array<i64: 1, 2048>}, {transform_indices = @transform_1, window_bounds = array<i64: 1, 2048>}]} {
    %c0 = arith.constant 0 : index
    %c0_0 = arith.constant 0 : index
    %0 = vector.load %arg1[%c0, %c0_0] : memref<1x2048xf32, #tpu.memory_space<vmem>>, vector<1x2048xf32>
    %1 = math.exp %0 : vector<1x2048xf32>
    %c0_1 = arith.constant 0 : index
    %c0_2 = arith.constant 0 : index
    %2 = vector.load %arg2[%c0_1, %c0_2] : memref<1x2048xf32, #tpu.memory_space<vmem>>, vector<1x2048xf32>
    tpu.vector_store %arg2[%c0_1, %c0_2], %1 {strides = array<i32>} : memref<1x2048xf32, #tpu.memory_space<vmem>>, vector<1x2048xf32>,
    return
  }
  func.func @transform_0(%arg0: i32) -> (i32, i32) {
    %c0_i32 = arith.constant 0 : i32
    %c0_i32_0 = arith.constant 0 : i32
    return %arg0, %c0_i32 : i32, i32
  }
  func.func @transform_1(%arg0: i32) -> (i32, i32) {
    %c0_i32 = arith.constant 0 : i32
    %c0_i32_0 = arith.constant 0 : i32
    return %arg0, %c0_i32 : i32, i32
  }
}

</mosaic_0001>

<bundles_post_ra>
// kernel: tpu_custom_call.1
= control target key start
LH: loop header
LB: loop body
LE: loop exit
PB: predicated region body
PF: predicated region fallthrough
CT: control target
= control target key end

     0   :  { %6 = vsyncpa [#allocation3], 0  ;;  %s124_s0 = inlined_call_operand.hbm [shape: f32[1,2048], index: 0, kind: input, shape index: {}]   ;;  %s125_s1 = inlined_call_operand.hbm [shape: f32[1,2048], index: 1, kind: output, shape index: {}]  }
   0x1   :  { %7 = vsyncpa [#allocation4], 0  ;;  %s13_s8 = sshll.u32 %s124_s0, 4  ;;  %s106_s9 = smov [#allocation2]   ;;  %s14_s8 = int_to_ptr.hbm [resolvable:$true] %s13_s8 }
   0x2   :  { %s15_s10 = sshll.u32 %s106_s9, 4  ;;  %s16_s10 = int_to_ptr.vmem [resolvable:$true] %s15_s10 }
   0x3   :  { %18 = dma.hbm_to_vmem [thread:$0]  %s14_s8, 256, %s16_s10, [#allocation3]  }
   0x4   :  { %102 = dma.done.wait [#allocation3], 256  }
   0x5   :  { %103 = vsyncadd [#allocation3], 4294967040  ;;  %v23_v0 = vld [vmem:[#allocation2] sm:$0xff]  ;;  %v24_v1 = vld [vmem:[#allocation2 + $0x8] sm:$0xff]  ;;  %s107_s11 = smov [#allocation5]   ;;  %s38_s15 = sshll.u32 %s125_s1, 4  ;;  %s39_s15 = int_to_ptr.hbm [resolvable:$true] %s38_s15 }
   0x6   :  { %v25_v2 = vmul.f32 1.442695, %v23_v0  ;;  %v27_v3 = vmul.f32 1.442695, %v24_v1  ;;  %s36_s12 = sshll.u32 %s107_s11, 4  ;;  %s37_s12 = int_to_ptr.vmem [resolvable:$true] %s36_s12 }
   0x8   :  { %50 = vpow2.f32 %v25_v2 }
   0x9   :  { %52 = vpow2.f32 %v27_v3 }
   0xe   :  { %v51_v4 = vpop.eup %50 }
   0xf   :  { %v53_v5 = vpop.eup %52  ;;  %29 = vst [vmem:[#allocation5] sm:$0xff] %v51_v4 }
  0x10   :  { %30 = vst [vmem:[#allocation5 + $0x8] sm:$0xff] %v53_v5 }
  0x11   :  { %41 = dma.vmem_to_hbm [thread:$0]  %s37_s12, 256, %s39_s15, [#allocation4]  }
  0x12   :  { %104 = dma.done.wait [#allocation4], 256  }
  0x13   :  { %105 = vsyncadd [#allocation4], 4294967040 }
  0x14   :  { %46 = vsyncpa [#allocation3], 1 }
  0x15   :  { %47 = vsyncpa [#allocation4], 1 }

</bundles_post_ra>
